<compile_context>
chip_gen: v5e
topology: v5e:2x2
jax: 0.10.0
libtpu: 0.0.40
codegen_flags: <defaults>
</compile_context>

<pallas_src>
import jax
import jax.numpy as jnp
from jax.experimental import pallas as pl
from jax.experimental.pallas import tpu as pltpu

F_REAL = 2        # Linear(2, 2) feature width
F_PAD = 128       # padded lane width
MAX_TB = 1024     # max batch rows per grid step (512 KiB f32 activation tile)


def _fp16_roundtrip(x):
    """Emulate fp32 -> fp16 -> fp32 (round-to-nearest-even on the 10-bit fp16
    mantissa) using integer bit tricks on the VPU.  Exact for values in the
    fp16 normal range (which this workload stays in)."""
    # TODO(synk): fp16 subnormal flush / overflow-to-inf / NaN payload edge
    # cases are not emulated (cannot occur for these small random-normal
    # activations).
    u = pltpu.bitcast(x, jnp.uint32)
    lsb = (u >> 13) & jnp.uint32(1)
    rounded = (u + jnp.uint32(0x0FFF) + lsb) & jnp.uint32(0xFFFFE000)
    return pltpu.bitcast(rounded, jnp.float32)


def _main_kernel(x_ref, p_ref, o_ref):
    # x_ref: (TB, 128) raw fp32 input (lanes >= 2 are zero).
    # p_ref: (3, 8, 128) packed params; layer l: sublanes 0/1 = W.T rows
    #        ([in, out] layout), sublane 2 = bias, everything else zero.
    def linear(h, layer):
        w = p_ref[layer]                                   # (8, 128)
        return h[:, 0:1] * w[0:1, :] + h[:, 1:2] * w[1:2, :] + w[2:3, :]

    x = _fp16_roundtrip(x_ref[...])   # x.to(float16) ... .to(float32)
    h = linear(x, 0)                  # g.l1  (fp32 compute)
    h = _fp16_roundtrip(h)            # .to(float16).to(float32)
    h = linear(h, 1)                  # a.l1  (checkpoint -> forward no-op)
    o_ref[...] = linear(h, 2)         # b.l1


def prepare_params(params):
    """Pack the three torch-layout Linear(2,2) layers into one (3, 8, 128)
    fp32 buffer.  Call once and reuse across forward calls."""
    def pack(w, b):
        t = jnp.zeros((8, F_PAD), jnp.float32)
        t = t.at[:F_REAL, :F_REAL].set(jnp.asarray(w, jnp.float32).T)  # [in,out]
        t = t.at[2, :F_REAL].set(jnp.asarray(b, jnp.float32))
        return t

    return jnp.stack([
        pack(params["g_w"], params["g_b"]),
        pack(params["a_w"], params["a_b"]),
        pack(params["b_w"], params["b_b"]),
    ])


@jax.jit
def main_with_non_forward_call(x, packed_params):
    """x: [N, 2] float32.  packed_params: output of prepare_params()."""
    n = x.shape[0]
    tb = min(MAX_TB, max(8, ((n + 7) // 8) * 8))
    n_pad = ((n + tb - 1) // tb) * tb

    # Only per-call prep: fused zero-pad to (n_pad, 128).  fp16 quantization
    # happens inside the kernel.
    x_p = jnp.zeros((n_pad, F_PAD), jnp.float32).at[:n, :F_REAL].set(x)

    out = pl.pallas_call(
        _main_kernel,
        out_shape=jax.ShapeDtypeStruct((n_pad, F_PAD), jnp.float32),
        grid=(n_pad // tb,),
        in_specs=[
            pl.BlockSpec((tb, F_PAD), lambda i: (i, 0)),
            pl.BlockSpec((3, 8, F_PAD), lambda i: (0, 0, 0)),
        ],
        out_specs=pl.BlockSpec((tb, F_PAD), lambda i: (i, 0)),
        compiler_params=pltpu.CompilerParams(
            dimension_semantics=("parallel",),
        ),
    )(x_p, packed_params)

    return out[:n, :F_REAL]


def init_params(key):
    """Deterministic init matching torch.nn.Linear(2, 2) defaults
    (Kaiming-uniform weights, bias U(-1/sqrt(fan_in), 1/sqrt(fan_in)))."""
    bound = 1.0 / jnp.sqrt(jnp.float32(F_REAL))
    ks = jax.random.split(key, 6)
    u = lambda k, shape: jax.random.uniform(
        k, shape, jnp.float32, minval=-bound, maxval=bound
    )
    return {
        "g_w": u(ks[0], (2, 2)), "g_b": u(ks[1], (2,)),
        "a_w": u(ks[2], (2, 2)), "a_b": u(ks[3], (2,)),
        "b_w": u(ks[4], (2, 2)), "b_b": u(ks[5], (2,)),
    }


if __name__ == "__main__":
    key = jax.random.PRNGKey(0)
    k_param, k_x = jax.random.split(key)
    params = init_params(k_param)
    packed = prepare_params(params)          # hoisted: done once, reused
    x = jax.random.normal(k_x, (8, 2), dtype=jnp.float32)

    y = main_with_non_forward_call(x, packed)
    y = jax.block_until_ready(y)
    assert y.shape == (8, 2) and y.dtype == jnp.float32

    # Sanity check against a pure-JAX reference of the same math.
    def ref(x, p):
        h = x.astype(jnp.float16).astype(jnp.float32)
        h = h @ p["g_w"].T + p["g_b"]
        h = h.astype(jnp.float16).astype(jnp.float32)
        h = h @ p["a_w"].T + p["a_b"]
        return h @ p["b_w"].T + p["b_b"]

    ref_y = ref(x, params)
    assert jnp.allclose(y, ref_y, atol=1e-5, rtol=1e-5)

    print("KERNEL_OK")
</pallas_src>

<mosaic_0001>
module attributes {stable_mosaic.version = 11 : i64} {
  func.func @_main_kernel(%arg0: i32, %arg1: memref<8x128xf32, #tpu.memory_space<vmem>>, %arg2: memref<3x8x128xf32, #tpu.memory_space<vmem>>, %arg3: memref<8x128xf32, #tpu.memory_space<vmem>>) attributes {dimension_semantics = [#tpu.dimension_semantics<parallel>], iteration_bounds = array<i64: 1>, scalar_prefetch = 0 : i64, scratch_operands = 0 : i64, tpu.core_type = #tpu.core_type<tc>, window_params = [{transform_indices = @transform_0, window_bounds = array<i64: 8, 128>}, {pipeline_mode = #tpu.pipeline_mode<synchronous>, transform_indices = @transform_1, window_bounds = array<i64: 3, 8, 128>}, {transform_indices = @transform_2, window_bounds = array<i64: 8, 128>}]} {
    %c0 = arith.constant 0 : index
    %c0_0 = arith.constant 0 : index
    %0 = vector.load %arg1[%c0, %c0_0] : memref<8x128xf32, #tpu.memory_space<vmem>>, vector<8x128xf32>
    %1 = tpu.bitcast %0 : vector<8x128xf32> -> vector<8x128xi32>
    %c13_i32 = arith.constant 13 : i32
    %2 = vector.broadcast %c13_i32 : i32 to vector<8x128xi32>
    %3 = arith.shrui %1, %2 : vector<8x128xi32>
    %c1_i32 = arith.constant 1 : i32
    %4 = vector.broadcast %c1_i32 : i32 to vector<8x128xi32>
    %5 = arith.andi %3, %4 : vector<8x128xi32>
    %c4095_i32 = arith.constant 4095 : i32
    %6 = vector.broadcast %c4095_i32 : i32 to vector<8x128xi32>
    %7 = arith.addi %1, %6 : vector<8x128xi32>
    %8 = arith.addi %7, %5 : vector<8x128xi32>
    %c-8192_i32 = arith.constant -8192 : i32
    %9 = vector.broadcast %c-8192_i32 : i32 to vector<8x128xi32>
    %10 = arith.andi %8, %9 : vector<8x128xi32>
    %11 = tpu.bitcast %10 : vector<8x128xi32> -> vector<8x128xf32>
    %c0_1 = arith.constant 0 : index
    %c0_2 = arith.constant 0 : index
    %c0_3 = arith.constant 0 : index
    %12 = vector.load %arg2[%c0_1, %c0_2, %c0_3] : memref<3x8x128xf32, #tpu.memory_space<vmem>>, vector<1x8x128xf32>
    %13 = vector.shape_cast %12 : vector<1x8x128xf32> to vector<8x128xf32>
    %14 = vector.extract_strided_slice %11 {offsets = [0, 0], sizes = [8, 1], strides = [1, 1]} : vector<8x128xf32> to vector<8x1xf32>
    %15 = vector.extract_strided_slice %13 {offsets = [0, 0], sizes = [1, 128], strides = [1, 1]} : vector<8x128xf32> to vector<1x128xf32>
    %16 = vector.broadcast %14 : vector<8x1xf32> to vector<8x128xf32>
    %17 = vector.broadcast %15 : vector<1x128xf32> to vector<8x128xf32>
    %18 = arith.mulf %16, %17 : vector<8x128xf32>
    %19 = vector.extract_strided_slice %11 {offsets = [0, 1], sizes = [8, 1], strides = [1, 1]} : vector<8x128xf32> to vector<8x1xf32>
    %20 = vector.extract_strided_slice %13 {offsets = [1, 0], sizes = [1, 128], strides = [1, 1]} : vector<8x128xf32> to vector<1x128xf32>
    %21 = vector.broadcast %19 : vector<8x1xf32> to vector<8x128xf32>
    %22 = vector.broadcast %20 : vector<1x128xf32> to vector<8x128xf32>
    %23 = arith.mulf %21, %22 : vector<8x128xf32>
    %24 = arith.addf %18, %23 : vector<8x128xf32>
    %25 = vector.extract_strided_slice %13 {offsets = [2, 0], sizes = [1, 128], strides = [1, 1]} : vector<8x128xf32> to vector<1x128xf32>
    %26 = vector.broadcast %25 : vector<1x128xf32> to vector<8x128xf32>
    %27 = arith.addf %24, %26 : vector<8x128xf32>
    %28 = tpu.bitcast %27 : vector<8x128xf32> -> vector<8x128xi32>
    %c13_i32_4 = arith.constant 13 : i32
    %29 = vector.broadcast %c13_i32_4 : i32 to vector<8x128xi32>
    %30 = arith.shrui %28, %29 : vector<8x128xi32>
    %c1_i32_5 = arith.constant 1 : i32
    %31 = vector.broadcast %c1_i32_5 : i32 to vector<8x128xi32>
    %32 = arith.andi %30, %31 : vector<8x128xi32>
    %c4095_i32_6 = arith.constant 4095 : i32
    %33 = vector.broadcast %c4095_i32_6 : i32 to vector<8x128xi32>
    %34 = arith.addi %28, %33 : vector<8x128xi32>
    %35 = arith.addi %34, %32 : vector<8x128xi32>
    %c-8192_i32_7 = arith.constant -8192 : i32
    %36 = vector.broadcast %c-8192_i32_7 : i32 to vector<8x128xi32>
    %37 = arith.andi %35, %36 : vector<8x128xi32>
    %38 = tpu.bitcast %37 : vector<8x128xi32> -> vector<8x128xf32>
    %c1 = arith.constant 1 : index
    %c0_8 = arith.constant 0 : index
    %c0_9 = arith.constant 0 : index
    %39 = vector.load %arg2[%c1, %c0_8, %c0_9] : memref<3x8x128xf32, #tpu.memory_space<vmem>>, vector<1x8x128xf32>
    %40 = vector.shape_cast %39 : vector<1x8x128xf32> to vector<8x128xf32>
    %41 = vector.extract_strided_slice %38 {offsets = [0, 0], sizes = [8, 1], strides = [1, 1]} : vector<8x128xf32> to vector<8x1xf32>
    %42 = vector.extract_strided_slice %40 {offsets = [0, 0], sizes = [1, 128], strides = [1, 1]} : vector<8x128xf32> to vector<1x128xf32>
    %43 = vector.broadcast %41 : vector<8x1xf32> to vector<8x128xf32>
    %44 = vector.broadcast %42 : vector<1x128xf32> to vector<8x128xf32>
    %45 = arith.mulf %43, %44 : vector<8x128xf32>
    %46 = vector.extract_strided_slice %38 {offsets = [0, 1], sizes = [8, 1], strides = [1, 1]} : vector<8x128xf32> to vector<8x1xf32>
    %47 = vector.extract_strided_slice %40 {offsets = [1, 0], sizes = [1, 128], strides = [1, 1]} : vector<8x128xf32> to vector<1x128xf32>
    %48 = vector.broadcast %46 : vector<8x1xf32> to vector<8x128xf32>
    %49 = vector.broadcast %47 : vector<1x128xf32> to vector<8x128xf32>
    %50 = arith.mulf %48, %49 : vector<8x128xf32>
    %51 = arith.addf %45, %50 : vector<8x128xf32>
    %52 = vector.extract_strided_slice %40 {offsets = [2, 0], sizes = [1, 128], strides = [1, 1]} : vector<8x128xf32> to vector<1x128xf32>
    %53 = vector.broadcast %52 : vector<1x128xf32> to vector<8x128xf32>
    %54 = arith.addf %51, %53 : vector<8x128xf32>
    %c2 = arith.constant 2 : index
    %c0_10 = arith.constant 0 : index
    %c0_11 = arith.constant 0 : index
    %55 = vector.load %arg2[%c2, %c0_10, %c0_11] : memref<3x8x128xf32, #tpu.memory_space<vmem>>, vector<1x8x128xf32>
    %56 = vector.shape_cast %55 : vector<1x8x128xf32> to vector<8x128xf32>
    %57 = vector.extract_strided_slice %54 {offsets = [0, 0], sizes = [8, 1], strides = [1, 1]} : vector<8x128xf32> to vector<8x1xf32>
    %58 = vector.extract_strided_slice %56 {offsets = [0, 0], sizes = [1, 128], strides = [1, 1]} : vector<8x128xf32> to vector<1x128xf32>
    %59 = vector.broadcast %57 : vector<8x1xf32> to vector<8x128xf32>
    %60 = vector.broadcast %58 : vector<1x128xf32> to vector<8x128xf32>
    %61 = arith.mulf %59, %60 : vector<8x128xf32>
    %62 = vector.extract_strided_slice %54 {offsets = [0, 1], sizes = [8, 1], strides = [1, 1]} : vector<8x128xf32> to vector<8x1xf32>
    %63 = vector.extract_strided_slice %56 {offsets = [1, 0], sizes = [1, 128], strides = [1, 1]} : vector<8x128xf32> to vector<1x128xf32>
    %64 = vector.broadcast %62 : vector<8x1xf32> to vector<8x128xf32>
    %65 = vector.broadcast %63 : vector<1x128xf32> to vector<8x128xf32>
    %66 = arith.mulf %64, %65 : vector<8x128xf32>
    %67 = arith.addf %61, %66 : vector<8x128xf32>
    %68 = vector.extract_strided_slice %56 {offsets = [2, 0], sizes = [1, 128], strides = [1, 1]} : vector<8x128xf32> to vector<1x128xf32>
    %69 = vector.broadcast %68 : vector<1x128xf32> to vector<8x128xf32>
    %70 = arith.addf %67, %69 : vector<8x128xf32>
    %c0_12 = arith.constant 0 : index
    %c0_13 = arith.constant 0 : index
    %71 = vector.load %arg3[%c0_12, %c0_13] : memref<8x128xf32, #tpu.memory_space<vmem>>, vector<8x128xf32>
    tpu.vector_store %arg3[%c0_12, %c0_13], %70 {strides = array<i32>} : memref<8x128xf32, #tpu.memory_space<vmem>>, vector<8x128xf32>,
    return
  }
  func.func @transform_0(%arg0: i32) -> (i32, i32) {
    %c0_i32 = arith.constant 0 : i32
    %c0_i32_0 = arith.constant 0 : i32
    return %arg0, %c0_i32 : i32, i32
  }
  func.func @transform_1(%arg0: i32) -> (i32, i32, i32) {
    %c0_i32 = arith.constant 0 : i32
    %c0_i32_0 = arith.constant 0 : i32
    %c0_i32_1 = arith.constant 0 : i32
    %c0_i32_2 = arith.constant 0 : i32
    return %c0_i32, %c0_i32_0, %c0_i32_1 : i32, i32, i32
  }
  func.func @transform_2(%arg0: i32) -> (i32, i32) {
    %c0_i32 = arith.constant 0 : i32
    %c0_i32_0 = arith.constant 0 : i32
    return %arg0, %c0_i32 : i32, i32
  }
}

</mosaic_0001>

<bundles_post_ra>
// kernel: main_with_non_forward_call.1
= control target key start
LH: loop header
LB: loop body
LE: loop exit
PB: predicated region body
PF: predicated region fallthrough
CT: control target
= control target key end

     0   :  { %v90_v0 = vmov 0   ;;  %v91_v7 = vmov 1   ;;  %s122_s0 = inlined_call_operand.vmem [shape: f32[8,128], index: 0, kind: input, shape index: {}]   ;;  %s123_s1 = inlined_call_operand.vmem [shape: f32[3,8,128], index: 1, kind: input, shape index: {}]   ;;  %s124_s2 = inlined_call_operand.vmem [shape: f32[8,128], index: 2, kind: output, shape index: {}]  }
   0x1   :  { %84 = vset.pattern.permute.xlu0 %v90_v0  ;;  %v11_v1 = vld [vmem:[%s122_s0] sm:$0xff]  ;;  %86 = vset.pattern.permute.xlu1 %v90_v0  ;;  %v80_v24 = vld [vmem:[%s123_s1 + $0x8] sm:$0xff]  ;;  %v81_v34 = vld [vmem:[%s123_s1 + $0x10] sm:$0xff] }
   0x2   :  { %v13_v2 = vshrl.u32 %v11_v1, 13  ;;  %v15_v3 = vadd.s32 4095, %v11_v1  ;;  %88 = vset.pattern.permute.xlu2 %v90_v0  ;;  %v18_v9 = vld [vmem:[%s123_s1] sm:$0xff]  ;;  %v46_v25 = vperm.slane %v80_v24, 0  ;;  %v52_v26 = vperm.slane %v80_v24, 1 }
   0x3   :  { %v23_v10 = vperm.slane %v18_v9, 0  ;;  %v29_v11 = vperm.slane %v18_v9, 1  ;;  %v32_v14 = vperm.slane %v18_v9, 2  ;;  %v55_v30 = vperm.slane %v80_v24, 2 }
   0x4   :  { %v14_v4 = vand.u32 1, %v13_v2  ;;  %v64_v35 = vperm.slane %v81_v34, 0  ;;  %v70_v36 = vperm.slane %v81_v34, 1  ;;  %v73_v39 = vperm.slane %v81_v34, 2 }
   0x6   :  { %v16_v5 = vadd.s32 %v15_v3, %v14_v4 }
   0x8   :  { %v17_v6 = vand.u32 4294959104, %v16_v5 }
   0xa   :  { %20 = vperm.xlu0 %84, %v17_v6  }
  0x12   :  { %85 = vset.pattern.permute.xlu0 %v91_v7 }
  0x13   :  { %26 = vperm.xlu0 %85, %v17_v6  }
  0x7c   :  { %v21_v8 = vpop.permute.xlu0 %20 }
  0x7d   :  { %v24_v13 = vmul.f32 %v23_v10, %v21_v8 }
  0x85   :  { %v27_v12 = vpop.permute.xlu0 %26 }
  0x86   :  { %v30_v15 = vmul.f32 %v29_v11, %v27_v12 }
  0x88   :  { %v31_v16 = vadd.f32 %v30_v15, %v24_v13 }
  0x8a   :  { %v33_v17 = vadd.f32 %v32_v14, %v31_v16 }
  0x8c   :  { %v35_v18 = vshrl.u32 %v33_v17, 13  ;;  %v37_v20 = vadd.s32 4095, %v33_v17 }
  0x8e   :  { %v36_v19 = vand.u32 1, %v35_v18 }
  0x90   :  { %v38_v21 = vadd.s32 %v37_v20, %v36_v19 }
  0x92   :  { %v39_v22 = vand.u32 4294959104, %v38_v21 }
  0x94   :  { %43 = vperm.xlu1 %86, %v39_v22  }
  0x9c   :  { %87 = vset.pattern.permute.xlu1 %v91_v7 }
  0x9d   :  { %49 = vperm.xlu1 %87, %v39_v22  }
 0x106   :  { %v44_v23 = vpop.permute.xlu1 %43 }
 0x107   :  { %v47_v28 = vmul.f32 %v46_v25, %v44_v23 }
 0x10f   :  { %v50_v27 = vpop.permute.xlu1 %49 }
 0x110   :  { %v53_v29 = vmul.f32 %v52_v26, %v50_v27 }
 0x112   :  { %v54_v31 = vadd.f32 %v53_v29, %v47_v28 }
 0x114   :  { %v56_v32 = vadd.f32 %v55_v30, %v54_v31 }
 0x116   :  { %61 = vperm.xlu2 %88, %v56_v32  }
 0x11e   :  { %89 = vset.pattern.permute.xlu2 %v91_v7 }
 0x11f   :  { %67 = vperm.xlu2 %89, %v56_v32  }
 0x170   :  { %v62_v33 = vpop.permute.xlu2 %61 }
 0x171   :  { %v65_v38 = vmul.f32 %v64_v35, %v62_v33 }
 0x179   :  { %v68_v37 = vpop.permute.xlu2 %67 }
 0x17a   :  { %v71_v40 = vmul.f32 %v70_v36, %v68_v37 }
 0x17c   :  { %v72_v41 = vadd.f32 %v71_v40, %v65_v38 }
 0x17e   :  { %v74_v42 = vadd.f32 %v73_v39, %v72_v41 }
 0x180   :  { %75 = vst [vmem:[%s124_s2] sm:$0xff] %v74_v42 }

</bundles_post_ra>
